<compile_context>
chip_gen: v7x
topology: tpu7x:2x2x1
jax: 0.10.0
libtpu: 0.0.40
codegen_flags: <defaults>
</compile_context>

<pallas_src>
import jax
import jax.numpy as jnp
from jax.experimental import pallas as pl
from jax.experimental.pallas import tpu as pltpu

_LANE = 128
_SUBLANE = 16  # bf16 sublane packing; also satisfies f32's 8-row requirement


def _round_up(n, m):
    return ((n + m - 1) // m) * m


def _cdiv(a, b):
    return -(-a // b)


def _tpu_config():
    """Generation-aware tiling / VMEM limits (conservative fallback if unknown)."""
    kind = ""
    try:
        kind = jax.devices()[0].device_kind.lower()
    except Exception:
        pass
    if "v7" in kind:
        # 64 MiB physical VMEM, 2 TensorCores per chip.
        return dict(vmem_limit=32 * 1024 * 1024, max_block_b=2048, two_cores=True)
    if "v6" in kind or "v5" in kind:
        # 128 MiB physical VMEM, single TensorCore.
        return dict(vmem_limit=64 * 1024 * 1024, max_block_b=4096, two_cores=False)
    return dict(vmem_limit=32 * 1024 * 1024, max_block_b=1024, two_cores=False)


def _choose_block_b(B, max_block_b, two_cores):
    """Pick a batch tile: as large as allowed, but >= 2 even steps on dual-TC chips."""
    b_aligned = _round_up(max(B, 1), _SUBLANE)
    steps = _cdiv(b_aligned, max_block_b)
    if two_cores and b_aligned > 512:
        steps = max(steps, 2)
        if steps % 2:
            steps += 1  # even -> both TensorCores get equal work
    bb = _round_up(_cdiv(b_aligned, steps), _SUBLANE)
    return min(bb, max_block_b, b_aligned)


def mlp_kernel(x_ref, w1_ref, b1_ref, w2_ref, b2_ref, w3_ref, b3_ref, o_ref):
    # Stage 1: Linear(in, hidden) + ReLU.  x cast to bf16 in-kernel (no HBM pad/cast),
    # small-K (K = in_feature) bf16 x bf16 -> f32 accumulation on the MXU.
    x = x_ref[...].astype(w1_ref.dtype)
    h1 = jnp.dot(x, w1_ref[...], preferred_element_type=jnp.float32)
    h1 = jnp.maximum(h1 + b1_ref[...], 0.0)
    # Stage 2: Linear(hidden, hidden) + ReLU.
    h2 = jnp.dot(h1.astype(w2_ref.dtype), w2_ref[...],
                 preferred_element_type=jnp.float32)
    h2 = jnp.maximum(h2 + b2_ref[...], 0.0)
    # Stage 3: Linear(hidden, out) + ReLU.  Lane-dense padded output, bf16 writeback.
    h3 = jnp.dot(h2.astype(w3_ref.dtype), w3_ref[...],
                 preferred_element_type=jnp.float32)
    o_ref[...] = jnp.maximum(h3 + b3_ref[...], 0.0).astype(o_ref.dtype)


def prepare_params(params, *, compute_dtype=jnp.bfloat16):
    """One-time padding/cast of the weights (hoisted out of the per-call hot path).

    Weights are stored [in, out] (transpose of torch's [out, in]) so the kernel
    computes x @ W + b directly.  Feature dims are zero-padded to multiples of 128
    for lane-dense vregs / full-width MXU passes; zero pads keep numerics unchanged.
    """
    w1, b1 = params["w1"], params["b1"]
    w2, b2 = params["w2"], params["b2"]
    w3, b3 = params["w3"], params["b3"]
    in_f, hidden = w1.shape
    out_f = w3.shape[1]
    hid_p = _round_up(hidden, _LANE)   # 500 -> 512
    out_p = _round_up(out_f, _LANE)    # 10  -> 128
    f32 = jnp.float32
    cdt = compute_dtype
    return {
        "w1": jnp.zeros((in_f, hid_p), cdt).at[:, :hidden].set(w1.astype(cdt)),
        "w2": jnp.zeros((hid_p, hid_p), cdt).at[:hidden, :hidden].set(w2.astype(cdt)),
        "w3": jnp.zeros((hid_p, out_p), cdt).at[:hidden, :out_f].set(w3.astype(cdt)),
        "b1": jnp.zeros((1, hid_p), f32).at[:, :hidden].set(b1.astype(f32).reshape(1, -1)),
        "b2": jnp.zeros((1, hid_p), f32).at[:, :hidden].set(b2.astype(f32).reshape(1, -1)),
        "b3": jnp.zeros((1, out_p), f32).at[:, :out_f].set(b3.astype(f32).reshape(1, -1)),
    }


def mlp_forward(x, prepared, *, out_feature, block_b=None, out_dtype=jnp.bfloat16):
    """Eval-mode MLP forward.  x: [B, in_feature] f32; prepared: prepare_params() output."""
    B, in_f = x.shape
    w1, b1 = prepared["w1"], prepared["b1"]
    w2, b2 = prepared["w2"], prepared["b2"]
    w3, b3 = prepared["w3"], prepared["b3"]
    hid_p = w1.shape[1]
    out_p = w3.shape[1]

    cfg = _tpu_config()
    max_bb = min(block_b, cfg["max_block_b"]) if block_b else cfg["max_block_b"]
    bb = _choose_block_b(B, max_bb, cfg["two_cores"])
    B_p = _round_up(B, bb)
    grid = (B_p // bb,)

    # Only the batch dim is ever padded (feature dim streams unpadded); zero rows
    # produce relu(bias) garbage that is sliced off below.
    xp = x if B_p == B else jnp.pad(x, ((0, B_p - B), (0, 0)))

    # Weights/biases are grid-invariant (constant index_map): fetched into VMEM once
    # and reused across all batch tiles.
    def resident(arr):
        ndim = arr.ndim
        return pl.BlockSpec(arr.shape, lambda i, _n=ndim: (0,) * _n)

    w_itemsize = jnp.dtype(w1.dtype).itemsize
    flops = 2 * B_p * (in_f * hid_p + hid_p * hid_p + hid_p * out_p)
    bytes_accessed = (
        B_p * in_f * jnp.dtype(x.dtype).itemsize
        + (w1.size + w2.size + w3.size) * w_itemsize
        + (b1.size + b2.size + b3.size) * 4
        + B_p * out_p * jnp.dtype(out_dtype).itemsize
    )

    out_padded = pl.pallas_call(
        mlp_kernel,
        out_shape=jax.ShapeDtypeStruct((B_p, out_p), out_dtype),
        grid_spec=pltpu.PrefetchScalarGridSpec(
            num_scalar_prefetch=0,
            grid=grid,
            in_specs=[
                pl.BlockSpec((bb, in_f), lambda i: (i, 0)),  # last dim == full array dim
                resident(w1), resident(b1),
                resident(w2), resident(b2),
                resident(w3), resident(b3),
            ],
            out_specs=pl.BlockSpec((bb, out_p), lambda i: (i, 0)),
        ),
        compiler_params=pltpu.CompilerParams(
            dimension_semantics=("parallel",),
            vmem_limit_bytes=cfg["vmem_limit"],
        ),
        cost_estimate=pl.CostEstimate(
            flops=flops, transcendentals=0, bytes_accessed=bytes_accessed
        ),
    )(xp, w1, b1, w2, b2, w3, b3)

    # Strip batch / output-feature padding; return in the caller's dtype.
    return out_padded[:B, :out_feature].astype(x.dtype)


def init_params(key, in_feature, out_feature, hidden=500):
    """Deterministic init mimicking torch.nn.Linear default (uniform +/- 1/sqrt(fan_in))."""
    ks = jax.random.split(key, 6)

    def linear(kw, kb, fan_in, fan_out):
        bound = 1.0 / jnp.sqrt(fan_in)
        # PyTorch stores W as (out, in); we store the transpose (in, out).
        w = jax.random.uniform(kw, (fan_in, fan_out), jnp.float32, -bound, bound)
        b = jax.random.uniform(kb, (1, fan_out), jnp.float32, -bound, bound)
        return w, b

    w1, b1 = linear(ks[0], ks[1], in_feature, hidden)
    w2, b2 = linear(ks[2], ks[3], hidden, hidden)
    w3, b3 = linear(ks[4], ks[5], hidden, out_feature)
    return {"w1": w1, "b1": b1, "w2": w2, "b2": b2, "w3": w3, "b3": b3}


def mlp_reference(x, params, compute_dtype=jnp.bfloat16, out_dtype=jnp.bfloat16):
    """Pure-JAX reference mirroring the kernel (bf16 matmul, f32 acc, bf16 output store)."""
    def dense_relu(h, w, b):
        y = jnp.dot(h.astype(compute_dtype), w.astype(compute_dtype),
                    preferred_element_type=jnp.float32)
        return jnp.maximum(y + b.astype(jnp.float32).reshape(1, -1), 0.0)

    h = dense_relu(x, params["w1"], params["b1"])
    h = dense_relu(h, params["w2"], params["b2"])
    h = dense_relu(h, params["w3"], params["b3"])
    return h.astype(out_dtype).astype(x.dtype)


if __name__ == "__main__":
    key = jax.random.PRNGKey(0)
    k_x, k_p = jax.random.split(key)

    batch = 8
    in_feature = 32
    out_feature = 10

    x = jax.random.normal(k_x, (batch, in_feature), dtype=jnp.float32)
    params = init_params(k_p, in_feature, out_feature)
    prepared = prepare_params(params)  # one-time pad + bf16 cast of weights/biases

    fwd = jax.jit(lambda xx, pp: mlp_forward(xx, pp, out_feature=out_feature))
    out = jax.block_until_ready(fwd(x, prepared))

    ref = mlp_reference(x, params)
    assert out.shape == (batch, out_feature)
    err = jnp.max(jnp.abs(out - ref))
    assert jnp.allclose(out, ref, atol=1e-2, rtol=1e-2), f"max abs err = {err}"

    print("KERNEL_OK")
</pallas_src>

<mosaic_0001>
module attributes {stable_mosaic.version = 11 : i64} {
  func.func @mlp_kernel(%arg0: i32, %arg1: memref<16x32xf32, #tpu.memory_space<vmem>>, %arg2: memref<32x512xbf16, #tpu.memory_space<vmem>>, %arg3: memref<1x512xf32, #tpu.memory_space<vmem>>, %arg4: memref<512x512xbf16, #tpu.memory_space<vmem>>, %arg5: memref<1x512xf32, #tpu.memory_space<vmem>>, %arg6: memref<512x128xbf16, #tpu.memory_space<vmem>>, %arg7: memref<1x128xf32, #tpu.memory_space<vmem>>, %arg8: memref<16x128xbf16, #tpu.memory_space<vmem>>) attributes {dimension_semantics = [#tpu.dimension_semantics<parallel>], iteration_bounds = array<i64: 1>, scalar_prefetch = 0 : i64, scratch_operands = 0 : i64, tpu.core_type = #tpu.core_type<tc>, window_params = [{transform_indices = @transform_0, window_bounds = array<i64: 16, 32>}, {pipeline_mode = #tpu.pipeline_mode<synchronous>, transform_indices = @transform_1, window_bounds = array<i64: 32, 512>}, {pipeline_mode = #tpu.pipeline_mode<synchronous>, transform_indices = @transform_2, window_bounds = array<i64: 1, 512>}, {pipeline_mode = #tpu.pipeline_mode<synchronous>, transform_indices = @transform_3, window_bounds = array<i64: 512, 512>}, {pipeline_mode = #tpu.pipeline_mode<synchronous>, transform_indices = @transform_4, window_bounds = array<i64: 1, 512>}, {pipeline_mode = #tpu.pipeline_mode<synchronous>, transform_indices = @transform_5, window_bounds = array<i64: 512, 128>}, {pipeline_mode = #tpu.pipeline_mode<synchronous>, transform_indices = @transform_6, window_bounds = array<i64: 1, 128>}, {transform_indices = @transform_7, window_bounds = array<i64: 16, 128>}]} {
    %c0 = arith.constant 0 : index
    %c0_0 = arith.constant 0 : index
    %0 = vector.load %arg1[%c0, %c0_0] : memref<16x32xf32, #tpu.memory_space<vmem>>, vector<16x32xf32>
    %1 = arith.truncf %0 : vector<16x32xf32> to vector<16x32xbf16>
    %c0_1 = arith.constant 0 : index
    %c0_2 = arith.constant 0 : index
    %2 = vector.load %arg2[%c0_1, %c0_2] : memref<32x512xbf16, #tpu.memory_space<vmem>>, vector<32x512xbf16>
    %cst = arith.constant dense<0.000000e+00> : vector<16x512xf32>
    %3 = tpu.matmul %1, %2, %cst {dimension_numbers = #tpu.dot_dimension_numbers<[1], [0], [0], [1], [0, 0, 1, 1], [], []>} : vector<16x32xbf16>, vector<32x512xbf16>, vector<16x512xf32> -> vector<16x512xf32>
    %c0_3 = arith.constant 0 : index
    %c0_4 = arith.constant 0 : index
    %4 = vector.load %arg3[%c0_3, %c0_4] : memref<1x512xf32, #tpu.memory_space<vmem>>, vector<1x512xf32>
    %5 = vector.broadcast %4 : vector<1x512xf32> to vector<16x512xf32>
    %6 = arith.addf %3, %5 : vector<16x512xf32>
    %cst_5 = arith.constant 0.000000e+00 : f32
    %7 = vector.broadcast %cst_5 : f32 to vector<16x512xf32>
    %8 = arith.maximumf %6, %7 : vector<16x512xf32>
    %9 = arith.truncf %8 : vector<16x512xf32> to vector<16x512xbf16>
    %c0_6 = arith.constant 0 : index
    %c0_7 = arith.constant 0 : index
    %10 = vector.load %arg4[%c0_6, %c0_7] : memref<512x512xbf16, #tpu.memory_space<vmem>>, vector<512x512xbf16>
    %cst_8 = arith.constant dense<0.000000e+00> : vector<16x512xf32>
    %11 = tpu.matmul %9, %10, %cst_8 {dimension_numbers = #tpu.dot_dimension_numbers<[1], [0], [0], [1], [0, 0, 1, 1], [], []>} : vector<16x512xbf16>, vector<512x512xbf16>, vector<16x512xf32> -> vector<16x512xf32>
    %c0_9 = arith.constant 0 : index
    %c0_10 = arith.constant 0 : index
    %12 = vector.load %arg5[%c0_9, %c0_10] : memref<1x512xf32, #tpu.memory_space<vmem>>, vector<1x512xf32>
    %13 = vector.broadcast %12 : vector<1x512xf32> to vector<16x512xf32>
    %14 = arith.addf %11, %13 : vector<16x512xf32>
    %cst_11 = arith.constant 0.000000e+00 : f32
    %15 = vector.broadcast %cst_11 : f32 to vector<16x512xf32>
    %16 = arith.maximumf %14, %15 : vector<16x512xf32>
    %17 = arith.truncf %16 : vector<16x512xf32> to vector<16x512xbf16>
    %c0_12 = arith.constant 0 : index
    %c0_13 = arith.constant 0 : index
    %18 = vector.load %arg6[%c0_12, %c0_13] : memref<512x128xbf16, #tpu.memory_space<vmem>>, vector<512x128xbf16>
    %cst_14 = arith.constant dense<0.000000e+00> : vector<16x128xf32>
    %19 = tpu.matmul %17, %18, %cst_14 {dimension_numbers = #tpu.dot_dimension_numbers<[1], [0], [0], [1], [0, 0, 1, 1], [], []>} : vector<16x512xbf16>, vector<512x128xbf16>, vector<16x128xf32> -> vector<16x128xf32>
    %c0_15 = arith.constant 0 : index
    %c0_16 = arith.constant 0 : index
    %20 = vector.load %arg7[%c0_15, %c0_16] : memref<1x128xf32, #tpu.memory_space<vmem>>, vector<1x128xf32>
    %21 = vector.broadcast %20 : vector<1x128xf32> to vector<16x128xf32>
    %22 = arith.addf %19, %21 : vector<16x128xf32>
    %cst_17 = arith.constant 0.000000e+00 : f32
    %23 = vector.broadcast %cst_17 : f32 to vector<16x128xf32>
    %24 = arith.maximumf %22, %23 : vector<16x128xf32>
    %25 = arith.truncf %24 : vector<16x128xf32> to vector<16x128xbf16>
    %c0_18 = arith.constant 0 : index
    %c0_19 = arith.constant 0 : index
    %26 = vector.load %arg8[%c0_18, %c0_19] : memref<16x128xbf16, #tpu.memory_space<vmem>>, vector<16x128xbf16>
    tpu.vector_store %arg8[%c0_18, %c0_19], %25 {strides = array<i32>} : memref<16x128xbf16, #tpu.memory_space<vmem>>, vector<16x128xbf16>,
    return
  }
  func.func @transform_0(%arg0: i32) -> (i32, i32) {
    %c0_i32 = arith.constant 0 : i32
    %c0_i32_0 = arith.constant 0 : i32
    return %arg0, %c0_i32 : i32, i32
  }
  func.func @transform_1(%arg0: i32) -> (i32, i32) {
    %c0_i32 = arith.constant 0 : i32
    %c0_i32_0 = arith.constant 0 : i32
    %c0_i32_1 = arith.constant 0 : i32
    return %c0_i32, %c0_i32_0 : i32, i32
  }
  func.func @transform_2(%arg0: i32) -> (i32, i32) {
    %c0_i32 = arith.constant 0 : i32
    %c0_i32_0 = arith.constant 0 : i32
    %c0_i32_1 = arith.constant 0 : i32
    return %c0_i32, %c0_i32_0 : i32, i32
  }
  func.func @transform_3(%arg0: i32) -> (i32, i32) {
    %c0_i32 = arith.constant 0 : i32
    %c0_i32_0 = arith.constant 0 : i32
    %c0_i32_1 = arith.constant 0 : i32
    return %c0_i32, %c0_i32_0 : i32, i32
  }
  func.func @transform_4(%arg0: i32) -> (i32, i32) {
    %c0_i32 = arith.constant 0 : i32
    %c0_i32_0 = arith.constant 0 : i32
    %c0_i32_1 = arith.constant 0 : i32
    return %c0_i32, %c0_i32_0 : i32, i32
  }
  func.func @transform_5(%arg0: i32) -> (i32, i32) {
    %c0_i32 = arith.constant 0 : i32
    %c0_i32_0 = arith.constant 0 : i32
    %c0_i32_1 = arith.constant 0 : i32
    return %c0_i32, %c0_i32_0 : i32, i32
  }
  func.func @transform_6(%arg0: i32) -> (i32, i32) {
    %c0_i32 = arith.constant 0 : i32
    %c0_i32_0 = arith.constant 0 : i32
    %c0_i32_1 = arith.constant 0 : i32
    return %c0_i32, %c0_i32_0 : i32, i32
  }
  func.func @transform_7(%arg0: i32) -> (i32, i32) {
    %c0_i32 = arith.constant 0 : i32
    %c0_i32_0 = arith.constant 0 : i32
    return %arg0, %c0_i32 : i32, i32
  }
}

</mosaic_0001>

<bundles_post_ra>
// kernel: _lambda_.1
= control target key start
LH: loop header
LB: loop body
LE: loop exit
PB: predicated region body
PF: predicated region fallthrough
CT: control target
= control target key end

     0   :  { %12 = vsyncpa [#allocation3], 0  ;;  %s2271_s0 = inlined_call_operand.vmem [shape: f32[16,32], index: 0, kind: input, shape index: {}]   ;;  %s2272_s1 = inlined_call_operand.hbm [shape: bf16[32,512], index: 1, kind: input, shape index: {}]   ;;  %s2273_s2 = inlined_call_operand.vmem [shape: f32[1,512], index: 2, kind: input, shape index: {}]   ;;  %s2274_s3 = inlined_call_operand.hbm [shape: bf16[512,512], index: 3, kind: input, shape index: {}]   ;;  %s2275_s4 = inlined_call_operand.vmem [shape: f32[1,512], index: 4, kind: input, shape index: {}]   ;;  %s2276_s5 = inlined_call_operand.hbm [shape: bf16[512,128], index: 5, kind: input, shape index: {}]   ;;  %s2277_s6 = inlined_call_operand.vmem [shape: f32[1,128], index: 6, kind: input, shape index: {}]   ;;  %s2278_s7 = inlined_call_operand.vmem [shape: bf16[16,128], index: 7, kind: output, shape index: {}]  }
   0x1   :  { %13 = vsyncpa [#allocation5], 0  ;;  %s2134_s24 = smov [#allocation4]   ;;  %s2135_s26 = smov [#allocation2]  }
   0x2   :  { %s35_s25 = sshll.u32 %s2134_s24, 4  ;;  %s21_s27 = sshll.u32 %s2135_s26, 4  ;;  %s36_s25 = int_to_ptr.vmem [resolvable:$true] %s35_s25  ;;  %s2182_s27 = int_to_ptr.vmem [resolvable:$true] %s21_s27 }
   0x3   :  { %s2064_s30 = scalar_lea.hbm %s2274_s3, 16384 }
   0x4   :  { %p2065_p0 = scmp.ne.s32.totalorder %s2274_s3, %s2064_s30  ;;  %p2068_p1 = scmp.lt.u32.totalorder %s2064_s30, %s2274_s3 }
   0x6   :  { %p2070_p2 = pnand %p2068_p1, %p2065_p0 }
   0x8   :  { %2073 = shalt.err (!%p2070_p2)
}
   0x9   :  { %s2074_s12 = scalar_lea.vmem %s36_s25, 16384  ;;  %p2079_p4 = scmp.lt.s32.totalorder %s36_s25, %s36_s25 }
   0xa   :  { %p2075_p3 = scmp.ne.s32.totalorder %s36_s25, %s2074_s12  ;;  %p2080_p5 = scmp.lt.s32.totalorder %s2074_s12, %s2074_s12 }
   0xc   :  { %p2081_p6 = por %p2080_p5, %p2079_p4 }
   0xe   :  { %p2082_p7 = pnand %p2081_p6, %p2075_p3 }
  0x10   :  { %2085 = shalt.err (!%p2082_p7)
}
  0x11   :  { %s2136_s13 = smov 256   ;;  %s2137_s14 = smov 16  }
  0x12   :  { %41 = dma.hbm_to_vmem [thread:$0]  %s2274_s3, 16384, %s36_s25, [#allocation5], %s2136_s13, %s2136_s13, %s2137_s14  }
  0x13   :  { %s2086_s19 = scalar_lea.hbm %s2272_s1, 1024 }
  0x14   :  { %p2087_p8 = scmp.ne.s32.totalorder %s2272_s1, %s2086_s19  ;;  %p2090_p9 = scmp.lt.u32.totalorder %s2086_s19, %s2272_s1 }
  0x16   :  { %p2092_p10 = pnand %p2090_p9, %p2087_p8 }
  0x18   :  { %2095 = shalt.err (!%p2092_p10)
}
  0x19   :  { %s2096_s24 = scalar_lea.vmem %s2182_s27, 1024  ;;  %p2101_p12 = scmp.lt.s32.totalorder %s2182_s27, %s2182_s27 }
  0x1a   :  { %p2097_p11 = scmp.ne.s32.totalorder %s2182_s27, %s2096_s24  ;;  %p2102_p13 = scmp.lt.s32.totalorder %s2096_s24, %s2096_s24 }
  0x1c   :  { %p2103_p0 = por %p2102_p13, %p2101_p12 }
  0x1e   :  { %p2104_p1 = pnand %p2103_p0, %p2097_p11 }
  0x20   :  { %2107 = shalt.err (!%p2104_p1)
}
  0x21   :  { %27 = dma.hbm_to_vmem [thread:$0]  %s2272_s1, 1024, %s2182_s27, [#allocation3], %s2136_s13, %s2136_s13, %s2137_s14  }
  0x22   :  { %s2138_s26 = smov [#allocation6]   ;;  %s2108_s8 = scalar_lea.hbm %s2276_s5, 4096 }
  0x23   :  { %s49_s28 = sshll.u32 %s2138_s26, 4  ;;  %p2109_p2 = scmp.ne.s32.totalorder %s2276_s5, %s2108_s8  ;;  %s50_s28 = int_to_ptr.vmem [resolvable:$true] %s49_s28 }
  0x24   :  { %p2112_p3 = scmp.lt.u32.totalorder %s2108_s8, %s2276_s5 }
  0x26   :  { %p2114_p4 = pnand %p2112_p3, %p2109_p2 }
  0x28   :  { %2117 = shalt.err (!%p2114_p4)
}
  0x29   :  { %s2118_s15 = scalar_lea.vmem %s50_s28, 4096  ;;  %p2123_p6 = scmp.lt.s32.totalorder %s50_s28, %s50_s28 }
  0x2a   :  { %p2119_p5 = scmp.ne.s32.totalorder %s50_s28, %s2118_s15  ;;  %p2124_p7 = scmp.lt.s32.totalorder %s2118_s15, %s2118_s15 }
  0x2c   :  { %p2125_p8 = por %p2124_p7, %p2123_p6 }
  0x2e   :  { %p2126_p9 = pnand %p2125_p8, %p2119_p5 }
  0x30   :  { %2129 = shalt.err (!%p2126_p9)
}
  0x31   :  { %s2139_s1 = smov 64   ;;  %s2140_s27 = smov 4  }
  0x32   :  { %55 = dma.hbm_to_vmem [thread:$0]  %s2276_s5, 4096, %s50_s28, [#allocation5], %s2139_s1, %s2139_s1, %s2140_s27  }
  0x33   :  { %2130 = dma.done.wait [#allocation3], 1024  }
  0x34   :  { %2131 = vsyncadd [#allocation3], 4294966272 }
  0x35   :  { %2132 = dma.done.wait [#allocation5], 20480  }
  0x36   :  { %2133 = vsyncadd [#allocation5], 4294946816  ;;  %v2141_v0 = vmov 0   ;;  %v1828_v1 = vld [vmem:[#allocation2 + $0x4] ss:$16 sps:$4 sm:$0xff]   ;;  %v69_v6 = vld [vmem:[%s2271_s0 + $0x8] sm:$0xff] }
  0x37   :  { %177 = vmatprep.mubr.bf16.mxu0 %v2141_v0  ;;  %220 = vmatprep.mubr.bf16.mxu1 %v2141_v0  ;;  %v1830_v2 = vld [vmem:[#allocation2] ss:$16 sps:$4 sm:$0xff]   ;;  %v1831_v3 = vld [vmem:[#allocation2 + $0x24] ss:$16 sps:$4 sm:$0xff]   ;;  %v1834_v7 = vld [vmem:[#allocation2 + $0xc] ss:$16 sps:$4 sm:$0xff]  }
  0x38   :  { %145 = vmatprep.subr.bf16.mxu0 %v1828_v1  ;;  %v1833_v4 = vld [vmem:[#allocation2 + $0x20] ss:$16 sps:$4 sm:$0xff]   ;;  %v1836_v8 = vld [vmem:[#allocation2 + $0x8] ss:$16 sps:$4 sm:$0xff]   ;;  %v1837_v9 = vld [vmem:[#allocation2 + $0x2c] ss:$16 sps:$4 sm:$0xff]   ;;  %188 = vmatprep.subr.bf16.mxu1 %v1834_v7 }
  0x39   :  { %v68_v5 = vld [vmem:[%s2271_s0] sm:$0xff]  ;;  %146 = vmatpush1.bf16.msra.mxu0 %v1830_v2  ;;  %v1839_v10 = vld [vmem:[#allocation2 + $0x28] ss:$16 sps:$4 sm:$0xff]   ;;  %vm141_vm0 = vcmask 261120   ;;  %189 = vmatpush1.bf16.msra.mxu1 %v1836_v8  ;;  %v1845_v14 = vld [vmem:[#allocation4 + $0xc] ss:$16 sps:$4 sm:$0xff]  }
  0x3a   :  { %147 = vmatprep.subr.bf16.mxu0 %v1831_v3  ;;  %v70_v11 = vpack.c.bf16 %v69_v6, %v68_v5  ;;  %v1840_v12 = vld [vmem:[#allocation4] ss:$16 sps:$4 sm:$0xff]   ;;  %v1842_v13 = vld [vmem:[#allocation4 + $0x4] ss:$16 sps:$4 sm:$0xff]   ;;  %190 = vmatprep.subr.bf16.mxu1 %v1837_v9  ;;  %v1843_v16 = vld [vmem:[#allocation4 + $0x8] ss:$16 sps:$4 sm:$0xff]  }
  0x3b   :  { %v1848_v15 = vld [vmem:[#allocation4 + $0x24] ss:$16 sps:$4 sm:$0xff]   ;;  %v1846_v17 = vld [vmem:[#allocation4 + $0x20] ss:$16 sps:$4 sm:$0xff]   ;;  %v1851_v18 = vld [vmem:[#allocation4 + $0x2c] ss:$16 sps:$4 sm:$0xff]  }
  0x3c   :  { %v1854_v19 = vld [vmem:[#allocation4 + $0x44] ss:$16 sps:$4 sm:$0xff]   ;;  %v1849_v20 = vld [vmem:[#allocation4 + $0x28] ss:$16 sps:$4 sm:$0xff]   ;;  %v1852_v21 = vld [vmem:[#allocation4 + $0x40] ss:$16 sps:$4 sm:$0xff]  }
  0x3d   :  { %148 = vmatpush1.bf16.msra.mxu0 %v1833_v4  ;;  %191 = vmatpush1.bf16.msra.mxu1 %v1839_v10  ;;  %v1857_v22 = vld [vmem:[#allocation4 + $0x4c] ss:$16 sps:$4 sm:$0xff]   ;;  %v1860_v23 = vld [vmem:[#allocation4 + $0x64] ss:$16 sps:$4 sm:$0xff]   ;;  %v1855_v24 = vld [vmem:[#allocation4 + $0x48] ss:$16 sps:$4 sm:$0xff]  }
  0x3e   :  { %1033 = vmatprep.subr.bf16.mxu0 %v1842_v13  ;;  %1119 = vmatprep.subr.bf16.mxu1 %v1845_v14  ;;  %v1858_v25 = vld [vmem:[#allocation4 + $0x60] ss:$16 sps:$4 sm:$0xff]   ;;  %v1863_v26 = vld [vmem:[#allocation4 + $0x6c] ss:$16 sps:$4 sm:$0xff]   ;;  %v1866_v27 = vld [vmem:[#allocation4 + $0x84] ss:$16 sps:$4 sm:$0xff]   ;;  %v81_v14 = vlaneseq }
  0x3f   :  { %v1861_v28 = vld [vmem:[#allocation4 + $0x68] ss:$16 sps:$4 sm:$0xff]   ;;  %v1864_v29 = vld [vmem:[#allocation4 + $0x80] ss:$16 sps:$4 sm:$0xff]   ;;  %v1869_v30 = vld [vmem:[#allocation4 + $0x8c] ss:$16 sps:$4 sm:$0xff]  }
  0x40   :  { %1588 = vmatmul.mubr.msk.bf16.vlgmr.msra.gmra.mrb[0].mxu0 %vm141_vm0, %v70_v11  ;;  %1589 = vmatmul.mubr.msk.bf16.vlgmr.msra.gmra.mrb[0].mxu1 %vm141_vm0, %v70_v11  ;;  %v1872_v31 = vld [vmem:[#allocation4 + $0xa4] ss:$16 sps:$4 sm:$0xff]   ;;  %v1867_v32 = vld [vmem:[#allocation4 + $0x88] ss:$16 sps:$4 sm:$0xff]   ;;  %v1870_v33 = vld [vmem:[#allocation4 + $0xa0] ss:$16 sps:$4 sm:$0xff]  }
  0x41   :  { %1034 = vmatpush1.bf16.msra.mxu0 %v1840_v12  ;;  %1120 = vmatpush1.bf16.msra.mxu1 %v1843_v16  ;;  %v1875_v34 = vld [vmem:[#allocation4 + $0xac] ss:$16 sps:$4 sm:$0xff]   ;;  %v1878_v35 = vld [vmem:[#allocation4 + $0xc4] ss:$16 sps:$4 sm:$0xff]   ;;  %v1873_v36 = vld [vmem:[#allocation4 + $0xa8] ss:$16 sps:$4 sm:$0xff]  }
  0x42   :  { %1035 = vmatprep.subr.bf16.mxu0 %v1848_v15  ;;  %1121 = vmatprep.subr.bf16.mxu1 %v1851_v18  ;;  %v1876_v37 = vld [vmem:[#allocation4 + $0xc0] ss:$16 sps:$4 sm:$0xff]   ;;  %v1881_v38 = vld [vmem:[#allocation4 + $0xcc] ss:$16 sps:$4 sm:$0xff]   ;;  %v1884_v39 = vld [vmem:[#allocation4 + $0xe4] ss:$16 sps:$4 sm:$0xff]  }
  0x43   :  { %v1879_v40 = vld [vmem:[#allocation4 + $0xc8] ss:$16 sps:$4 sm:$0xff]   ;;  %v1882_v41 = vld [vmem:[#allocation4 + $0xe0] ss:$16 sps:$4 sm:$0xff]   ;;  %v1887_v42 = vld [vmem:[#allocation4 + $0xec] ss:$16 sps:$4 sm:$0xff]  }
  0x44   :  { %v1890_v43 = vld [vmem:[#allocation4 + $0x104] ss:$16 sps:$4 sm:$0xff]   ;;  %v1885_v44 = vld [vmem:[#allocation4 + $0xe8] ss:$16 sps:$4 sm:$0xff]   ;;  %v1888_v45 = vld [vmem:[#allocation4 + $0x100] ss:$16 sps:$4 sm:$0xff]  }
  0x45   :  { %1036 = vmatpush1.bf16.msra.mxu0 %v1846_v17  ;;  %1122 = vmatpush1.bf16.msra.mxu1 %v1849_v20  ;;  %v1893_v46 = vld [vmem:[#allocation4 + $0x10c] ss:$16 sps:$4 sm:$0xff]   ;;  %v1896_v47 = vld [vmem:[#allocation4 + $0x124] ss:$16 sps:$4 sm:$0xff]   ;;  %v1891_v48 = vld [vmem:[#allocation4 + $0x108] ss:$16 sps:$4 sm:$0xff]  }
  0x46   :  { %1037 = vmatprep.subr.bf16.mxu0 %v1854_v19  ;;  %1123 = vmatprep.subr.bf16.mxu1 %v1857_v22  ;;  %v1894_v49 = vld [vmem:[#allocation4 + $0x120] ss:$16 sps:$4 sm:$0xff]   ;;  %v1899_v50 = vld [vmem:[#allocation4 + $0x12c] ss:$16 sps:$4 sm:$0xff]   ;;  %v1902_v51 = vld [vmem:[#allocation4 + $0x144] ss:$16 sps:$4 sm:$0xff]  }
  0x47   :  { %v1897_v52 = vld [vmem:[#allocation4 + $0x128] ss:$16 sps:$4 sm:$0xff]   ;;  %v1900_v53 = vld [vmem:[#allocation4 + $0x140] ss:$16 sps:$4 sm:$0xff]   ;;  %v1905_v54 = vld [vmem:[#allocation4 + $0x14c] ss:$16 sps:$4 sm:$0xff]  }
  0x48   :  { %v1908_v55 = vld [vmem:[#allocation4 + $0x164] ss:$16 sps:$4 sm:$0xff]   ;;  %v1903_v56 = vld [vmem:[#allocation4 + $0x148] ss:$16 sps:$4 sm:$0xff]   ;;  %v1906_v57 = vld [vmem:[#allocation4 + $0x160] ss:$16 sps:$4 sm:$0xff]  }
  0x49   :  { %1038 = vmatpush1.bf16.msra.mxu0 %v1852_v21  ;;  %1124 = vmatpush1.bf16.msra.mxu1 %v1855_v24  ;;  %v1911_v58 = vld [vmem:[#allocation4 + $0x16c] ss:$16 sps:$4 sm:$0xff]   ;;  %v1914_v59 = vld [vmem:[#allocation4 + $0x184] ss:$16 sps:$4 sm:$0xff]   ;;  %v1909_v60 = vld [vmem:[#allocation4 + $0x168] ss:$16 sps:$4 sm:$0xff]  }
  0x4a   :  { %1039 = vmatprep.subr.bf16.mxu0 %v1860_v23  ;;  %1125 = vmatprep.subr.bf16.mxu1 %v1863_v26  ;;  %v1912_v61 = vld [vmem:[#allocation4 + $0x180] ss:$16 sps:$4 sm:$0xff]   ;;  %v1917_v62 = vld [vmem:[#allocation4 + $0x18c] ss:$16 sps:$4 sm:$0xff]   ;;  %v1920_v63 = vld [vmem:[#allocation4 + $0x1a4] ss:$16 sps:$4 sm:$0xff]  }
  0x4b   :  { %v1915_v0 = vld [vmem:[#allocation4 + $0x188] ss:$16 sps:$4 sm:$0xff]   ;;  %v1918_v1 = vld [vmem:[#allocation4 + $0x1a0] ss:$16 sps:$4 sm:$0xff]   ;;  %v1923_v2 = vld [vmem:[#allocation4 + $0x1ac] ss:$16 sps:$4 sm:$0xff]  }
  0x4c   :  { %v1921_v3 = vld [vmem:[#allocation4 + $0x1a8] ss:$16 sps:$4 sm:$0xff]   ;;  %v1926_v4 = vld [vmem:[#allocation4 + $0x1c4] ss:$16 sps:$4 sm:$0xff]   ;;  %v1929_v5 = vld [vmem:[#allocation4 + $0x1cc] ss:$16 sps:$4 sm:$0xff]  }
  0x4d   :  { %1040 = vmatpush1.bf16.msra.mxu0 %v1858_v25  ;;  %1126 = vmatpush1.bf16.msra.mxu1 %v1861_v28  ;;  %v1924_v6 = vld [vmem:[#allocation4 + $0x1c0] ss:$16 sps:$4 sm:$0xff]   ;;  %v1927_v7 = vld [vmem:[#allocation4 + $0x1c8] ss:$16 sps:$4 sm:$0xff]   ;;  %v1932_v8 = vld [vmem:[#allocation4 + $0x1e4] ss:$16 sps:$4 sm:$0xff]  }
  0x4e   :  { %1041 = vmatprep.subr.bf16.mxu0 %v1866_v27  ;;  %1127 = vmatprep.subr.bf16.mxu1 %v1869_v30  ;;  %v1935_v9 = vld [vmem:[#allocation4 + $0x1ec] ss:$16 sps:$4 sm:$0xff]   ;;  %v1930_v10 = vld [vmem:[#allocation4 + $0x1e0] ss:$16 sps:$4 sm:$0xff]   ;;  %v1933_v11 = vld [vmem:[#allocation4 + $0x1e8] ss:$16 sps:$4 sm:$0xff]  }
  0x4f   :  { %v1938_v12 = vld [vmem:[#allocation4 + $0x204] ss:$16 sps:$4 sm:$0xff]   ;;  %v1941_v13 = vld [vmem:[#allocation4 + $0x20c] ss:$16 sps:$4 sm:$0xff]   ;;  %v2233_v15 = vshrl.u32 %v81_v14, 7 }
  0x50   :  { %v79_v17 = vld [vmem:[%s2273_s2] sm:$0xf]  ;;  %v1975_v14 = vld [vmem:[#allocation4 + $0x2c8] ss:$16 sps:$4 sm:$0xff]  }
  0x51   :  { %1042 = vmatpush1.bf16.msra.mxu0 %v1864_v29  ;;  %1128 = vmatpush1.bf16.msra.mxu1 %v1867_v32  ;;  %v83_v16 = vsub.s32 0, %v2233_v15  ;;  %v87_v18 = vsub.s32 1, %v2233_v15  ;;  %v91_v20 = vsub.s32 2, %v2233_v15  ;;  %v95_v22 = vsub.s32 3, %v2233_v15 }
  0x52   :  { %1043 = vmatprep.subr.bf16.mxu0 %v1872_v31  ;;  %1129 = vmatprep.subr.bf16.mxu1 %v1875_v34 }
  0x53   :  { %v84_v19 = vrot.slane %v79_v17, %v83_v16  ;;  %v88_v21 = vrot.slane %v79_v17, %v87_v18  ;;  %v92_v26 = vrot.slane %v79_v17, %v91_v20  ;;  %v96_v29 = vrot.slane %v79_v17, %v95_v22  ;;  %v1980_v17 = vld [vmem:[#allocation4 + $0x2e4] ss:$16 sps:$4 sm:$0xff]  }
  0x55   :  { %1044 = vmatpush1.bf16.msra.mxu0 %v1870_v33  ;;  %1130 = vmatpush1.bf16.msra.mxu1 %v1873_v36 }
  0x56   :  { %1045 = vmatprep.subr.bf16.mxu0 %v1878_v35  ;;  %1131 = vmatprep.subr.bf16.mxu1 %v1881_v38 }
  0x59   :  { %1046 = vmatpush1.bf16.msra.mxu0 %v1876_v37  ;;  %1132 = vmatpush1.bf16.msra.mxu1 %v1879_v40 }
  0x5a   :  { %1047 = vmatprep.subr.bf16.mxu0 %v1884_v39  ;;  %1133 = vmatprep.subr.bf16.mxu1 %v1887_v42 }
  0x5d   :  { %1048 = vmatpush1.bf16.msra.mxu0 %v1882_v41  ;;  %1134 = vmatpush1.bf16.msra.mxu1 %v1885_v44 }
  0x5e   :  { %1049 = vmatprep.subr.bf16.mxu0 %v1890_v43  ;;  %1135 = vmatprep.subr.bf16.mxu1 %v1893_v46 }
  0x61   :  { %1050 = vmatpush1.bf16.msra.mxu0 %v1888_v45  ;;  %1136 = vmatpush1.bf16.msra.mxu1 %v1891_v48  ;;  %v1939_v48 = vld [vmem:[#allocation4 + $0x208] ss:$16 sps:$4 sm:$0xff]  }
  0x62   :  { %1051 = vmatprep.subr.bf16.mxu0 %v1896_v47  ;;  %1137 = vmatprep.subr.bf16.mxu1 %v1899_v50  ;;  %v1936_v47 = vld [vmem:[#allocation4 + $0x200] ss:$16 sps:$4 sm:$0xff]  }
  0x65   :  { %1052 = vmatpush1.bf16.msra.mxu0 %v1894_v49  ;;  %1138 = vmatpush1.bf16.msra.mxu1 %v1897_v52  ;;  %v1947_v52 = vld [vmem:[#allocation4 + $0x22c] ss:$16 sps:$4 sm:$0xff]  }
  0x66   :  { %1053 = vmatprep.subr.bf16.mxu0 %v1902_v51  ;;  %1139 = vmatprep.subr.bf16.mxu1 %v1905_v54  ;;  %v1944_v51 = vld [vmem:[#allocation4 + $0x224] ss:$16 sps:$4 sm:$0xff]  }
  0x69   :  { %1054 = vmatpush1.bf16.msra.mxu0 %v1900_v53  ;;  %1140 = vmatpush1.bf16.msra.mxu1 %v1903_v56  ;;  %v1942_v56 = vld [vmem:[#allocation4 + $0x220] ss:$16 sps:$4 sm:$0xff]  }
  0x6a   :  { %1055 = vmatprep.subr.bf16.mxu0 %v1908_v55  ;;  %1141 = vmatprep.subr.bf16.mxu1 %v1911_v58 }
  0x6d   :  { %1056 = vmatpush1.bf16.msra.mxu0 %v1906_v57  ;;  %1142 = vmatpush1.bf16.msra.mxu1 %v1909_v60  ;;  %v1945_v57 = vld [vmem:[#allocation4 + $0x228] ss:$16 sps:$4 sm:$0xff]   ;;  %v1953_v60 = vld [vmem:[#allocation4 + $0x24c] ss:$16 sps:$4 sm:$0xff]  }
  0x6e   :  { %1057 = vmatprep.subr.bf16.mxu0 %v1914_v59  ;;  %1143 = vmatprep.subr.bf16.mxu1 %v1917_v62  ;;  %v1950_v59 = vld [vmem:[#allocation4 + $0x244] ss:$16 sps:$4 sm:$0xff]   ;;  %v1951_v62 = vld [vmem:[#allocation4 + $0x248] ss:$16 sps:$4 sm:$0xff]  }
  0x71   :  { %1058 = vmatpush1.bf16.msra.mxu0 %v1912_v61  ;;  %1144 = vmatpush1.bf16.msra.mxu1 %v1915_v0  ;;  %v1948_v61 = vld [vmem:[#allocation4 + $0x240] ss:$16 sps:$4 sm:$0xff]   ;;  %v1959_v0 = vld [vmem:[#allocation4 + $0x26c] ss:$16 sps:$4 sm:$0xff]  }
  0x72   :  { %1059 = vmatprep.subr.bf16.mxu0 %v1920_v63  ;;  %1145 = vmatprep.subr.bf16.mxu1 %v1923_v2  ;;  %v1956_v63 = vld [vmem:[#allocation4 + $0x264] ss:$16 sps:$4 sm:$0xff]   ;;  %v1957_v2 = vld [vmem:[#allocation4 + $0x268] ss:$16 sps:$4 sm:$0xff]  }
  0x75   :  { %1060 = vmatpush1.bf16.msra.mxu0 %v1918_v1  ;;  %1146 = vmatpush1.bf16.msra.mxu1 %v1921_v3  ;;  %v1954_v1 = vld [vmem:[#allocation4 + $0x260] ss:$16 sps:$4 sm:$0xff]   ;;  %v1962_v3 = vld [vmem:[#allocation4 + $0x284] ss:$16 sps:$4 sm:$0xff]  }
  0x76   :  { %1061 = vmatprep.subr.bf16.mxu0 %v1926_v4  ;;  %1147 = vmatprep.subr.bf16.mxu1 %v1929_v5  ;;  %v1965_v4 = vld [vmem:[#allocation4 + $0x28c] ss:$16 sps:$4 sm:$0xff]   ;;  %v1960_v5 = vld [vmem:[#allocation4 + $0x280] ss:$16 sps:$4 sm:$0xff]  }
  0x79   :  { %1062 = vmatpush1.bf16.msra.mxu0 %v1924_v6  ;;  %1148 = vmatpush1.bf16.msra.mxu1 %v1927_v7  ;;  %v1963_v6 = vld [vmem:[#allocation4 + $0x288] ss:$16 sps:$4 sm:$0xff]   ;;  %v1968_v7 = vld [vmem:[#allocation4 + $0x2a4] ss:$16 sps:$4 sm:$0xff]  }
  0x7a   :  { %1063 = vmatprep.subr.bf16.mxu0 %v1932_v8  ;;  %1149 = vmatprep.subr.bf16.mxu1 %v1935_v9  ;;  %v1971_v8 = vld [vmem:[#allocation4 + $0x2ac] ss:$16 sps:$4 sm:$0xff]   ;;  %v1966_v9 = vld [vmem:[#allocation4 + $0x2a0] ss:$16 sps:$4 sm:$0xff]  }
  0x7d   :  { %1064 = vmatpush1.bf16.msra.mxu0 %v1930_v10  ;;  %1150 = vmatpush1.bf16.msra.mxu1 %v1933_v11  ;;  %v1969_v10 = vld [vmem:[#allocation4 + $0x2a8] ss:$16 sps:$4 sm:$0xff]   ;;  %v1974_v11 = vld [vmem:[#allocation4 + $0x2c4] ss:$16 sps:$4 sm:$0xff]  }
  0x7e   :  { %1076 = vmatprep.subr.bf16.mxu0 %v1938_v12  ;;  %1162 = vmatprep.subr.bf16.mxu1 %v1941_v13  ;;  %v1977_v12 = vld [vmem:[#allocation4 + $0x2cc] ss:$16 sps:$4 sm:$0xff]   ;;  %v1972_v13 = vld [vmem:[#allocation4 + $0x2c0] ss:$16 sps:$4 sm:$0xff]  }
 0x113   :  { %v179_v23 = vpop.f32.mrb[0].mxu0  ;;  %v222_v33 = vpop.f32.mrb[0].mxu1 }
 0x114   :  { %v180_v24 = vadd.f32 %v179_v23, %v84_v19  ;;  %v181_v25 = vpop.f32.mrb[1].mxu0  ;;  %v223_v36 = vadd.f32 %v222_v33, %v92_v26  ;;  %v224_v37 = vpop.f32.mrb[1].mxu1  ;;  %v1981_v23 = vld [vmem:[#allocation4 + $0x2e8] ss:$16 sps:$4 sm:$0xff]   ;;  %v2001_v33 = vld [vmem:[#allocation4 + $0x34c] ss:$16 sps:$4 sm:$0xff]  }
 0x115   :  { %v182_v27 = vadd.f32 %v181_v25, %v88_v21  ;;  %v183_v28 = vpop.f32.mrb[2].mxu0  ;;  %v225_v40 = vadd.f32 %v224_v37, %v96_v29  ;;  %v226_v41 = vpop.f32.mrb[2].mxu1  ;;  %v1989_v25 = vld [vmem:[#allocation4 + $0x30c] ss:$16 sps:$4 sm:$0xff]  }
 0x116   :  { %v184_v30 = vadd.f32 %v183_v28, %v84_v19  ;;  %v185_v31 = vpop.f32.mrb[3].mxu0  ;;  %v231_v34 = vmax.f32 %v180_v24, 0.0  ;;  %v233_v43 = vmax.f32 %v223_v36, 0.0  ;;  %v227_v44 = vadd.f32 %v226_v41, %v92_v26  ;;  %v228_v45 = vpop.f32.mrb[3].mxu1  ;;  %v1983_v19 = vld [vmem:[#allocation4 + $0x2ec] ss:$16 sps:$4 sm:$0xff]  }
 0x117   :  { %v186_v32 = vadd.f32 %v185_v31, %v88_v21  ;;  %v232_v38 = vmax.f32 %v182_v27, 0.0  ;;  %v234_v49 = vmax.f32 %v225_v40, 0.0  ;;  %v229_v50 = vadd.f32 %v228_v45, %v96_v29  ;;  %v1978_v21 = vld [vmem:[#allocation4 + $0x2e0] ss:$16 sps:$4 sm:$0xff]   ;;  %v1986_v24 = vld [vmem:[#allocation4 + $0x304] ss:$16 sps:$4 sm:$0xff]  }
 0x118   :  { %v235_v35 = vmax.f32 %v184_v30, 0.0  ;;  %v237_v53 = vmax.f32 %v227_v44, 0.0  ;;  %v1984_v26 = vld [vmem:[#allocation4 + $0x300] ss:$16 sps:$4 sm:$0xff]   ;;  %v1987_v27 = vld [vmem:[#allocation4 + $0x308] ss:$16 sps:$4 sm:$0xff]  }
 0x119   :  { %v236_v39 = vmax.f32 %v186_v32, 0.0  ;;  %v238_v54 = vmax.f32 %v229_v50, 0.0  ;;  %v1992_v28 = vld [vmem:[#allocation4 + $0x324] ss:$16 sps:$4 sm:$0xff]   ;;  %v1995_v29 = vld [vmem:[#allocation4 + $0x32c] ss:$16 sps:$4 sm:$0xff]  }
 0x11a   :  { %v239_v42 = vpack.c.bf16 %v235_v35, %v231_v34  ;;  %v2250_v55 = vpack.c.bf16 %v237_v53, %v233_v43  ;;  %v1990_v30 = vld [vmem:[#allocation4 + $0x320] ss:$16 sps:$4 sm:$0xff]   ;;  %v1993_v31 = vld [vmem:[#allocation4 + $0x328] ss:$16 sps:$4 sm:$0xff]   ;;  %v1998_v32 = vld [vmem:[#allocation4 + $0x344] ss:$16 sps:$4 sm:$0xff]  }
 0x11b   :  { %v240_v46 = vpack.c.bf16 %v236_v39, %v232_v38  ;;  %v242_v58 = vpack.c.bf16 %v238_v54, %v234_v49  ;;  %v1996_v34 = vld [vmem:[#allocation4 + $0x340] ss:$16 sps:$4 sm:$0xff]   ;;  %v1999_v35 = vld [vmem:[#allocation4 + $0x348] ss:$16 sps:$4 sm:$0xff]   ;;  %v2004_v36 = vld [vmem:[#allocation4 + $0x364] ss:$16 sps:$4 sm:$0xff]  }
 0x11c   :  { %v2007_v37 = vld [vmem:[#allocation4 + $0x36c] ss:$16 sps:$4 sm:$0xff]   ;;  %v2002_v38 = vld [vmem:[#allocation4 + $0x360] ss:$16 sps:$4 sm:$0xff]   ;;  %v2005_v39 = vld [vmem:[#allocation4 + $0x368] ss:$16 sps:$4 sm:$0xff]  }
 0x11d   :  { %1065 = vmatprep.mubr.bf16.mxu0 %v240_v46  ;;  %1151 = vmatprep.mubr.bf16.mxu1 %v240_v46  ;;  %v2010_v40 = vld [vmem:[#allocation4 + $0x384] ss:$16 sps:$4 sm:$0xff]   ;;  %v2013_v41 = vld [vmem:[#allocation4 + $0x38c] ss:$16 sps:$4 sm:$0xff]   ;;  %v2011_v43 = vld [vmem:[#allocation4 + $0x388] ss:$16 sps:$4 sm:$0xff]  }
 0x11e   :  { %1066 = vmatmul.mubr.bf16.vlgmr.msra.gmra.mrb[4].mxu0 %v239_v42  ;;  %1152 = vmatmul.mubr.bf16.vlgmr.msra.gmra.mrb[4].mxu1 %v239_v42  ;;  %v2008_v42 = vld [vmem:[#allocation4 + $0x380] ss:$16 sps:$4 sm:$0xff]   ;;  %v2016_v44 = vld [vmem:[#allocation4 + $0x3a4] ss:$16 sps:$4 sm:$0xff]   ;;  %v2019_v45 = vld [vmem:[#allocation4 + $0x3ac] ss:$16 sps:$4 sm:$0xff]  }
 0x11f   :  { %1077 = vmatpush1.bf16.msra.mxu0 %v1936_v47  ;;  %1163 = vmatpush1.bf16.msra.mxu1 %v1939_v48  ;;  %v2014_v46 = vld [vmem:[#allocation4 + $0x3a0] ss:$16 sps:$4 sm:$0xff]   ;;  %v2017_v47 = vld [vmem:[#allocation4 + $0x3a8] ss:$16 sps:$4 sm:$0xff]   ;;  %v2022_v48 = vld [vmem:[#allocation4 + $0x3c4] ss:$16 sps:$4 sm:$0xff]  }
 0x120   :  { %1078 = vmatprep.subr.bf16.mxu0 %v1944_v51  ;;  %1164 = vmatprep.subr.bf16.mxu1 %v1947_v52  ;;  %v2025_v49 = vld [vmem:[#allocation4 + $0x3cc] ss:$16 sps:$4 sm:$0xff]   ;;  %v2020_v50 = vld [vmem:[#allocation4 + $0x3c0] ss:$16 sps:$4 sm:$0xff]   ;;  %v2023_v51 = vld [vmem:[#allocation4 + $0x3c8] ss:$16 sps:$4 sm:$0xff]  }
 0x121   :  { %1108 = vmatprep.mubr.bf16.mxu0 %v242_v58  ;;  %1194 = vmatprep.mubr.bf16.mxu1 %v242_v58  ;;  %v2028_v52 = vld [vmem:[#allocation4 + $0x3e4] ss:$16 sps:$4 sm:$0xff]   ;;  %v2031_v53 = vld [vmem:[#allocation4 + $0x3ec] ss:$16 sps:$4 sm:$0xff]   ;;  %v2026_v54 = vld [vmem:[#allocation4 + $0x3e0] ss:$16 sps:$4 sm:$0xff]  }
 0x122   :  { %v2033_v58 = vld [vmem:[#allocation6 + $0xc0] sm:$0xff]  }
 0x123   :  { %1079 = vmatpush1.bf16.msra.mxu0 %v1942_v56  ;;  %1165 = vmatpush1.bf16.msra.mxu1 %v1945_v57  ;;  %v2029_v56 = vld [vmem:[#allocation4 + $0x3e8] ss:$16 sps:$4 sm:$0xff]   ;;  %v2032_v57 = vld [vmem:[#allocation6 + $0x40] sm:$0xff]  }
 0x124   :  { %1080 = vmatprep.subr.bf16.mxu0 %v1950_v59  ;;  %1166 = vmatprep.subr.bf16.mxu1 %v1953_v60  ;;  %v2034_v59 = vld [vmem:[#allocation6] sm:$0xff]  }
 0x125   :  { %v2035_v60 = vld [vmem:[#allocation6 + $0x80] sm:$0xff]  }
 0x127   :  { %1081 = vmatpush1.bf16.msra.mxu0 %v1948_v61  ;;  %1167 = vmatpush1.bf16.msra.mxu1 %v1951_v62  ;;  %v2036_v61 = vld [vmem:[#allocation6 + $0x48] sm:$0xff]  }
 0x128   :  { %1082 = vmatprep.subr.bf16.mxu0 %v1956_v63  ;;  %1168 = vmatprep.subr.bf16.mxu1 %v1959_v0  ;;  %v2037_v62 = vld [vmem:[#allocation6 + $0xc8] sm:$0xff]  }
 0x129   :  { %v2038_v63 = vld [vmem:[#allocation6 + $0x8] sm:$0xff]  }
 0x12a   :  { %v2039_v0 = vld [vmem:[#allocation6 + $0x88] sm:$0xff]  }
 0x12b   :  { %1083 = vmatpush1.bf16.msra.mxu0 %v1954_v1  ;;  %1169 = vmatpush1.bf16.msra.mxu1 %v1957_v2  ;;  %v2040_v1 = vld [vmem:[#allocation6 + $0x50] sm:$0xff]  }
 0x12c   :  { %1084 = vmatprep.subr.bf16.mxu0 %v1962_v3  ;;  %1170 = vmatprep.subr.bf16.mxu1 %v1965_v4  ;;  %v2041_v2 = vld [vmem:[#allocation6 + $0xd0] sm:$0xff]  }
 0x12d   :  { %v2042_v3 = vld [vmem:[#allocation6 + $0x10] sm:$0xff]  }
 0x12e   :  { %v2043_v4 = vld [vmem:[#allocation6 + $0x90] sm:$0xff]  }
 0x12f   :  { %1085 = vmatpush1.bf16.msra.mxu0 %v1960_v5  ;;  %1171 = vmatpush1.bf16.msra.mxu1 %v1963_v6  ;;  %v2044_v5 = vld [vmem:[#allocation6 + $0x58] sm:$0xff]  }
 0x130   :  { %1086 = vmatprep.subr.bf16.mxu0 %v1968_v7  ;;  %1172 = vmatprep.subr.bf16.mxu1 %v1971_v8  ;;  %v2045_v6 = vld [vmem:[#allocation6 + $0xd8] sm:$0xff]   ;;  %v2048_v8 = vld [vmem:[#allocation6 + $0x60] sm:$0xff]  }
 0x131   :  { %v2046_v7 = vld [vmem:[#allocation6 + $0x18] sm:$0xff]  }
 0x133   :  { %1087 = vmatpush1.bf16.msra.mxu0 %v1966_v9  ;;  %1173 = vmatpush1.bf16.msra.mxu1 %v1969_v10  ;;  %v2049_v9 = vld [vmem:[#allocation6 + $0xe0] sm:$0xff]  }
 0x134   :  { %1088 = vmatprep.subr.bf16.mxu0 %v1974_v11  ;;  %1174 = vmatprep.subr.bf16.mxu1 %v1977_v12  ;;  %v2050_v10 = vld [vmem:[#allocation6 + $0x20] sm:$0xff]   ;;  %v2052_v12 = vld [vmem:[#allocation6 + $0x68] sm:$0xff]  }
 0x135   :  { %v2051_v11 = vld [vmem:[#allocation6 + $0xa0] sm:$0xff]  }
 0x137   :  { %1089 = vmatpush1.bf16.msra.mxu0 %v1972_v13  ;;  %1175 = vmatpush1.bf16.msra.mxu1 %v1975_v14  ;;  %v2053_v13 = vld [vmem:[#allocation6 + $0xe8] sm:$0xff]  }
 0x138   :  { %1090 = vmatprep.subr.bf16.mxu0 %v1980_v17  ;;  %1176 = vmatprep.subr.bf16.mxu1 %v1983_v19  ;;  %v2054_v14 = vld [vmem:[#allocation6 + $0x28] sm:$0xff]   ;;  %v2056_v19 = vld [vmem:[#allocation6 + $0x70] sm:$0xff]  }
 0x139   :  { %v2055_v17 = vld [vmem:[#allocation6 + $0xa8] sm:$0xff]  }
 0x13b   :  { %1091 = vmatpush1.bf16.msra.mxu0 %v1978_v21  ;;  %1177 = vmatpush1.bf16.msra.mxu1 %v1981_v23  ;;  %v2057_v21 = vld [vmem:[#allocation6 + $0xf0] sm:$0xff]  }
 0x13c   :  { %1092 = vmatprep.subr.bf16.mxu0 %v1986_v24  ;;  %1178 = vmatprep.subr.bf16.mxu1 %v1989_v25  ;;  %v2058_v23 = vld [vmem:[#allocation6 + $0x30] sm:$0xff]   ;;  %v2060_v25 = vld [vmem:[#allocation6 + $0x78] sm:$0xff]  }
 0x13d   :  { %v2059_v24 = vld [vmem:[#allocation6 + $0xb0] sm:$0xff]  }
 0x13f   :  { %1093 = vmatpush1.bf16.msra.mxu0 %v1984_v26  ;;  %1179 = vmatpush1.bf16.msra.mxu1 %v1987_v27  ;;  %v2061_v26 = vld [vmem:[#allocation6 + $0xf8] sm:$0xff]  }
 0x140   :  { %1094 = vmatprep.subr.bf16.mxu0 %v1992_v28  ;;  %1180 = vmatprep.subr.bf16.mxu1 %v1995_v29  ;;  %v2062_v27 = vld [vmem:[#allocation6 + $0x38] sm:$0xff]   ;;  %v371_v29 = vld [vmem:[%s2275_s4] sm:$0xf] }
 0x141   :  { %v2063_v28 = vld [vmem:[#allocation6 + $0xb8] sm:$0xff]  }
 0x143   :  { %1095 = vmatpush1.bf16.msra.mxu0 %v1990_v30  ;;  %1181 = vmatpush1.bf16.msra.mxu1 %v1993_v31  ;;  %v376_v30 = vrot.slane %v371_v29, %v83_v16  ;;  %v384_v31 = vrot.slane %v371_v29, %v91_v20 }
 0x144   :  { %1096 = vmatprep.subr.bf16.mxu0 %v1998_v32  ;;  %1182 = vmatprep.subr.bf16.mxu1 %v2001_v33  ;;  %v380_v32 = vrot.slane %v371_v29, %v87_v18  ;;  %v388_v33 = vrot.slane %v371_v29, %v95_v22 }
 0x147   :  { %1097 = vmatpush1.bf16.msra.mxu0 %v1996_v34  ;;  %1183 = vmatpush1.bf16.msra.mxu1 %v1999_v35 }
 0x148   :  { %1098 = vmatprep.subr.bf16.mxu0 %v2004_v36  ;;  %1184 = vmatprep.subr.bf16.mxu1 %v2007_v37 }
 0x14b   :  { %1099 = vmatpush1.bf16.msra.mxu0 %v2002_v38  ;;  %1185 = vmatpush1.bf16.msra.mxu1 %v2005_v39 }
 0x14c   :  { %1100 = vmatprep.subr.bf16.mxu0 %v2010_v40  ;;  %1186 = vmatprep.subr.bf16.mxu1 %v2013_v41 }
 0x14f   :  { %1101 = vmatpush1.bf16.msra.mxu0 %v2008_v42  ;;  %1187 = vmatpush1.bf16.msra.mxu1 %v2011_v43 }
 0x150   :  { %1102 = vmatprep.subr.bf16.mxu0 %v2016_v44  ;;  %1188 = vmatprep.subr.bf16.mxu1 %v2019_v45 }
 0x153   :  { %1103 = vmatpush1.bf16.msra.mxu0 %v2014_v46  ;;  %1189 = vmatpush1.bf16.msra.mxu1 %v2017_v47 }
 0x154   :  { %1104 = vmatprep.subr.bf16.mxu0 %v2022_v48  ;;  %1190 = vmatprep.subr.bf16.mxu1 %v2025_v49 }
 0x157   :  { %1105 = vmatpush1.bf16.msra.mxu0 %v2020_v50  ;;  %1191 = vmatpush1.bf16.msra.mxu1 %v2023_v51 }
 0x158   :  { %1106 = vmatprep.subr.bf16.mxu0 %v2028_v52  ;;  %1192 = vmatprep.subr.bf16.mxu1 %v2031_v53 }
 0x15b   :  { %1107 = vmatpush1.bf16.msra.mxu0 %v2026_v54  ;;  %1193 = vmatpush1.bf16.msra.mxu1 %v2029_v56 }
 0x15c   :  { %1760 = vmatprep.subr.bf16.mxu0 %v2032_v57  ;;  %1782 = vmatprep.subr.bf16.mxu1 %v2033_v58 }
 0x15e   :  { %1109 = vmatmul.mubr.bf16.vlgmr.msra.gmra.mrb[4].mxu0 %v2250_v55  ;;  %1195 = vmatmul.mubr.bf16.vlgmr.msra.gmra.mrb[4].mxu1 %v2250_v55  ;;  %v2047_v55 = vld [vmem:[#allocation6 + $0x98] sm:$0xff]  }
 0x15f   :  { %1761 = vmatpush3.bf16.msra.mxu0 %v2034_v59  ;;  %1783 = vmatpush3.bf16.msra.mxu1 %v2035_v60  ;;  %v1718_v60 = vld [vmem:[%s2277_s6] ss:$0 sm:$0xff] }
 0x160   :  { %1762 = vmatprep.subr.bf16.mxu0 %v2036_v61  ;;  %1784 = vmatprep.subr.bf16.mxu1 %v2037_v62 }
 0x163   :  { %1763 = vmatpush3.bf16.msra.mxu0 %v2038_v63  ;;  %1785 = vmatpush3.bf16.msra.mxu1 %v2039_v0 }
 0x164   :  { %1764 = vmatprep.subr.bf16.mxu0 %v2040_v1  ;;  %1786 = vmatprep.subr.bf16.mxu1 %v2041_v2 }
 0x167   :  { %1765 = vmatpush3.bf16.msra.mxu0 %v2042_v3  ;;  %1787 = vmatpush3.bf16.msra.mxu1 %v2043_v4 }
 0x168   :  { %1766 = vmatprep.subr.bf16.mxu0 %v2044_v5  ;;  %1788 = vmatprep.subr.bf16.mxu1 %v2045_v6 }
 0x16b   :  { %1767 = vmatpush3.bf16.msra.mxu0 %v2046_v7  ;;  %1789 = vmatpush3.bf16.msra.mxu1 %v2047_v55 }
 0x16c   :  { %1768 = vmatprep.subr.bf16.mxu0 %v2048_v8  ;;  %1790 = vmatprep.subr.bf16.mxu1 %v2049_v9 }
 0x16f   :  { %1769 = vmatpush3.bf16.msra.mxu0 %v2050_v10  ;;  %1791 = vmatpush3.bf16.msra.mxu1 %v2051_v11 }
 0x170   :  { %1770 = vmatprep.subr.bf16.mxu0 %v2052_v12  ;;  %1792 = vmatprep.subr.bf16.mxu1 %v2053_v13 }
 0x173   :  { %1771 = vmatpush3.bf16.msra.mxu0 %v2054_v14  ;;  %1793 = vmatpush3.bf16.msra.mxu1 %v2055_v17 }
 0x174   :  { %1772 = vmatprep.subr.bf16.mxu0 %v2056_v19  ;;  %1794 = vmatprep.subr.bf16.mxu1 %v2057_v21 }
 0x177   :  { %1773 = vmatpush3.bf16.msra.mxu0 %v2058_v23  ;;  %1795 = vmatpush3.bf16.msra.mxu1 %v2059_v24 }
 0x178   :  { %1774 = vmatprep.subr.bf16.mxu0 %v2060_v25  ;;  %1796 = vmatprep.subr.bf16.mxu1 %v2061_v26 }
 0x17b   :  { %1775 = vmatpush3.bf16.msra.mxu0 %v2062_v27  ;;  %1797 = vmatpush3.bf16.msra.mxu1 %v2063_v28 }
 0x231   :  { %v1110_v34 = vpop.f32.mrb[4].mxu0  ;;  %v1196_v35 = vpop.f32.mrb[4].mxu1 }
 0x232   :  { %v1804_v36 = vadd.f32 %v1110_v34, %v376_v30  ;;  %v1808_v37 = vadd.f32 %v1196_v35, %v384_v31  ;;  %v1112_v38 = vpop.f32.mrb[5].mxu0  ;;  %v1198_v39 = vpop.f32.mrb[5].mxu1 }
 0x233   :  { %v1805_v40 = vadd.f32 %v1112_v38, %v380_v32  ;;  %v1809_v41 = vadd.f32 %v1198_v39, %v388_v33  ;;  %v1114_v42 = vpop.f32.mrb[6].mxu0  ;;  %v1200_v43 = vpop.f32.mrb[6].mxu1 }
 0x234   :  { %v1806_v16 = vadd.f32 %v1114_v42, %v376_v30  ;;  %v1810_v44 = vadd.f32 %v1200_v43, %v384_v31  ;;  %v1116_v45 = vpop.f32.mrb[7].mxu0  ;;  %v1202_v20 = vpop.f32.mrb[7].mxu1  ;;  %v1205_v18 = vmax.f32 %v1804_v36, 0.0  ;;  %v1207_v48 = vmax.f32 %v1808_v37, 0.0 }
 0x235   :  { %v1807_v46 = vadd.f32 %v1116_v45, %v380_v32  ;;  %v1811_v47 = vadd.f32 %v1202_v20, %v388_v33  ;;  %v1206_v49 = vmax.f32 %v1805_v40, 0.0  ;;  %v1208_v50 = vmax.f32 %v1809_v41, 0.0 }
 0x236   :  { %v1209_v15 = vmax.f32 %v1806_v16, 0.0  ;;  %v1211_v22 = vmax.f32 %v1810_v44, 0.0 }
 0x237   :  { %v1210_v51 = vmax.f32 %v1807_v46, 0.0  ;;  %v1212_v52 = vmax.f32 %v1811_v47, 0.0 }
 0x238   :  { %v1213_v53 = vpack.c.bf16 %v1209_v15, %v1205_v18  ;;  %v1215_v54 = vpack.c.bf16 %v1211_v22, %v1207_v48 }
 0x239   :  { %v1214_v56 = vpack.c.bf16 %v1210_v51, %v1206_v49  ;;  %v1216_v57 = vpack.c.bf16 %v1212_v52, %v1208_v50 }
 0x23b   :  { %1512 = vmatprep.mubr.bf16.mxu0 %v1214_v56  ;;  %1553 = vmatprep.mubr.bf16.mxu1 %v1216_v57 }
 0x23c   :  { %1513 = vmatmul.mubr.bf16.vlgmr.msra.gmra.mrb[8].mxu0 %v1213_v53  ;;  %1554 = vmatmul.mubr.bf16.vlgmr.msra.gmra.mrb[8].mxu1 %v1215_v54 }
 0x30f   :  { %v1776_v58 = vpop.f32.mrb[8].mxu0  ;;  %v1798_v59 = vpop.f32.mrb[8].mxu1 }
 0x310   :  { %v1777_v61 = vpop.f32.mrb[9].mxu0  ;;  %v1799_v62 = vpop.f32.mrb[9].mxu1 }
 0x311   :  { %v1778_v63 = vadd.f32 %v1777_v61, %v1776_v58  ;;  %v1800_v0 = vadd.f32 %v1799_v62, %v1798_v59  ;;  %v1779_v1 = vpop.f32.mrb[10].mxu0  ;;  %v1801_v2 = vpop.f32.mrb[10].mxu1 }
 0x312   :  { %v1780_v3 = vpop.f32.mrb[11].mxu0  ;;  %v1802_v4 = vpop.f32.mrb[11].mxu1 }
 0x313   :  { %v1515_v5 = vadd.f32 %v1778_v63, %v1718_v60  ;;  %v1781_v6 = vadd.f32 %v1780_v3, %v1779_v1  ;;  %v1803_v7 = vadd.f32 %v1802_v4, %v1801_v2 }
 0x315   :  { %v1556_v55 = vadd.f32 %v1800_v0, %v1515_v5  ;;  %v1518_v8 = vadd.f32 %v1781_v6, %v1718_v60 }
 0x317   :  { %v1559_v9 = vadd.f32 %v1803_v7, %v1518_v8  ;;  %v1562_v10 = vmax.f32 %v1556_v55, 0.0 }
 0x319   :  { %v1563_v11 = vmax.f32 %v1559_v9, 0.0 }
 0x31b   :  { %v1758_v12 = vpack.c.bf16 %v1563_v11, %v1562_v10 }
 0x31d   :  { %1759 = vst [vmem:[%s2278_s7] sm:$0xff] %v1758_v12  }
 0x31e   :  { %1578 = vsyncpa [#allocation3], 1 }
 0x31f   :  { %1579 = vsyncpa [#allocation5], 1 }

</bundles_post_ra>
